<compile_context>
chip_gen: v7x
topology: tpu7x:2x2x1
jax: 0.10.0
libtpu: 0.0.40
codegen_flags: <defaults>
</compile_context>

<pallas_src>
import jax
import jax.numpy as jnp
from jax.experimental import pallas as pl
from jax.experimental.pallas import tpu as pltpu


def _value_head_kernel(x_ref, w_ref, b_ref, o_ref):
    # x_ref: (TM, H) VMEM, w_ref: (1, H) VMEM, b_ref: (1,) SMEM, o_ref: (1, TM) VMEM
    # Transposed-RHS contraction over H of both operands yields a lane-dense
    # (1, TM) row of per-token values (full-lane unmasked store).
    acc = jax.lax.dot_general(
        w_ref[...], x_ref[...],
        dimension_numbers=(((1,), (1,)), ((), ())),
        preferred_element_type=jnp.float32,
    )                                           # (1, TM) f32
    o_ref[...] = (acc + b_ref[0]).astype(o_ref.dtype)


def _vmem_capacity_bytes():
    """Per-core VMEM capacity; conservative 64 MiB (v7x) if query unavailable."""
    try:
        return int(pltpu.get_tpu_info().vmem_capacity_bytes)
    except Exception:
        return 64 << 20


def _pick_row_tile(m, h, itemsize, budget_bytes):
    """Largest row tile whose (tm, H) block fits the per-buffer VMEM budget.

    Tiles are multiples of 128 rows (valid sublane multiple for f32/bf16/int8
    and keeps the (1, tm) output block lane-aligned) unless a single block
    covers all rows.  For non-trivial M the tile is additionally capped so the
    grid has >= 2 (prefer >= 4) steps — required for megacore sharding on v7x
    and for any DMA/compute/writeback overlap.
    """
    row_bytes = h * itemsize
    rows = max(1, budget_bytes // row_bytes)
    if rows >= m:
        if m <= 256:
            return m                       # single full-extent block
        target_steps = 4 if m >= 4 * 128 else 2
        rows = pl.cdiv(m, target_steps)
        rows = ((rows + 127) // 128) * 128   # round up: keeps step count ~target
        return min(rows, m)
    rows = max(128, (rows // 128) * 128)
    # TODO(synk): for extreme H (>= ~36K f32) the 128-row floor + double
    # buffering could exceed v7x's 64 MiB VMEM; an H-split reduction grid axis
    # with an f32 (1, tm) accumulator would be needed there.
    return min(rows, m)


def _vmem_limit_bytes(tm, h, itemsize, capacity):
    """Exact scoped-VMEM accounting + slack, clamped below physical capacity."""
    x_bytes = 2 * tm * h * itemsize           # double-buffered streamed x tiles
    w_bytes = 2 * 8 * h * itemsize            # (1, H) weight, sublane-padded, x2 bufs
    out_bytes = 2 * 8 * tm * itemsize         # (1, tm) output, sublane-padded, x2 bufs
    slack = 6 << 20                           # Mosaic internal scratch / semaphores
    limit = x_bytes + w_bytes + out_bytes + slack
    return int(max(8 << 20, min(limit, capacity - (16 << 20))))


def value_head_forward(hidden_states, weight, bias, *, vmem_tile_bytes=None):
    """hidden_states: (B, S, H); weight: (1, H) [torch Linear layout]; bias: (1,)."""
    B, S, H = hidden_states.shape
    M = B * S
    dtype = hidden_states.dtype
    itemsize = jnp.dtype(dtype).itemsize

    capacity = _vmem_capacity_bytes()
    if vmem_tile_bytes is None:
        # 16 MiB per x buffer (32 MiB double-buffered): roofline regime on all
        # generations and comfortably inside v7x's 64 MiB per-core VMEM.
        vmem_tile_bytes = min(16 << 20, capacity // 4)

    tm = _pick_row_tile(M, H, itemsize, vmem_tile_bytes)
    G = pl.cdiv(M, tm)          # partial final block handled by Pallas
    Mp = G * tm                 # lane-dense padded output width

    x = hidden_states.reshape(M, H)             # free row-major reshape
    # Weight cast to activation dtype (deliberate: keeps a single MXU input
    # dtype; accumulation stays f32 via preferred_element_type).
    w = weight.reshape(1, H).astype(dtype)
    b = bias.reshape(1).astype(jnp.float32)     # scalar bias -> SMEM

    cost = pl.CostEstimate(
        flops=2 * M * H,
        transcendentals=0,
        bytes_accessed=M * H * itemsize + H * itemsize + Mp * itemsize,
    )

    out = pl.pallas_call(
        _value_head_kernel,
        out_shape=jax.ShapeDtypeStruct((1, Mp), dtype),
        grid_spec=pltpu.PrefetchScalarGridSpec(
            num_scalar_prefetch=0,
            grid=(G,),
            in_specs=[
                pl.BlockSpec((tm, H), lambda i: (i, 0)),            # streamed x rows
                pl.BlockSpec((1, H), lambda i: (0, 0)),             # resident weight
                pl.BlockSpec(memory_space=pltpu.MemorySpace.SMEM),  # bias scalar
            ],
            out_specs=pl.BlockSpec((1, tm), lambda i: (0, i)),      # lane-dense slab
        ),
        compiler_params=pltpu.CompilerParams(
            dimension_semantics=("parallel",),                      # shard rows across TCs
            vmem_limit_bytes=_vmem_limit_bytes(tm, H, itemsize, capacity),
        ),
        cost_estimate=cost,
    )(x, w, b)

    # Drop padded tail lanes (stale data from the partial final input block)
    # only when padding exists, then restore the (B, S, 1) module output shape.
    out = out.reshape(Mp)
    if Mp != M:
        out = out[:M]
    return out.reshape(B, S, 1)


if __name__ == "__main__":
    # Small shapes implied by the forward: (batch, seq, hidden)
    B, S, H = 2, 8, 32
    key = jax.random.PRNGKey(0)
    k_x, k_w, k_b = jax.random.split(key, 3)

    hidden_states = jax.random.normal(k_x, (B, S, H), dtype=jnp.float32)
    # Deterministic parameter init (nn.Linear(hidden_size, 1) shapes).
    weight = jax.random.normal(k_w, (1, H), dtype=jnp.float32) * 0.02
    bias = jax.random.normal(k_b, (1,), dtype=jnp.float32) * 0.02

    # TODO(synk): nn.Dropout is identity at inference; training-time dropout
    # masking (with p=0.1) is not implemented in the kernel.

    out = value_head_forward(hidden_states, weight, bias)
    out = jax.block_until_ready(out)

    # Cross-check against plain-JAX reference.
    ref = hidden_states @ weight.T + bias  # (B, S, 1)
    assert out.shape == (B, S, 1)
    assert jnp.allclose(out, ref, atol=1e-5, rtol=1e-5)

    print("KERNEL_OK")
</pallas_src>

<mosaic_0001>
module attributes {stable_mosaic.version = 11 : i64} {
  func.func @_value_head_kernel(%arg0: i32, %arg1: memref<16x32xf32, #tpu.memory_space<vmem>>, %arg2: memref<1x32xf32, #tpu.memory_space<vmem>>, %arg3: memref<1xf32, #tpu.memory_space<smem>>, %arg4: memref<1x16xf32, #tpu.memory_space<vmem>>) attributes {dimension_semantics = [#tpu.dimension_semantics<parallel>], iteration_bounds = array<i64: 1>, scalar_prefetch = 0 : i64, scratch_operands = 0 : i64, tpu.core_type = #tpu.core_type<tc>, window_params = [{transform_indices = @transform_0, window_bounds = array<i64: 16, 32>}, {pipeline_mode = #tpu.pipeline_mode<synchronous>, transform_indices = @transform_1, window_bounds = array<i64: 1, 32>}, {transform_indices = @transform_2, window_bounds = array<i64: 1>}, {transform_indices = @transform_3, window_bounds = array<i64: 1, 16>}]} {
    %c0 = arith.constant 0 : index
    %c0_0 = arith.constant 0 : index
    %0 = vector.load %arg2[%c0, %c0_0] : memref<1x32xf32, #tpu.memory_space<vmem>>, vector<1x32xf32>
    %c0_1 = arith.constant 0 : index
    %c0_2 = arith.constant 0 : index
    %1 = vector.load %arg1[%c0_1, %c0_2] : memref<16x32xf32, #tpu.memory_space<vmem>>, vector<16x32xf32>
    %cst = arith.constant dense<0.000000e+00> : vector<1x16xf32>
    %2 = tpu.matmul %0, %1, %cst {dimension_numbers = #tpu.dot_dimension_numbers<[1], [1], [0], [0], [0, 0, 1, 0], [], []>} : vector<1x32xf32>, vector<16x32xf32>, vector<1x16xf32> -> vector<1x16xf32>
    %c0_3 = arith.constant 0 : index
    %3 = memref.load %arg3[%c0_3] : memref<1xf32, #tpu.memory_space<smem>>
    %4 = vector.broadcast %3 : f32 to vector<1x16xf32>
    %5 = arith.addf %2, %4 : vector<1x16xf32>
    %c0_4 = arith.constant 0 : index
    %c0_5 = arith.constant 0 : index
    %6 = vector.load %arg4[%c0_4, %c0_5] : memref<1x16xf32, #tpu.memory_space<vmem>>, vector<1x16xf32>
    tpu.vector_store %arg4[%c0_4, %c0_5], %5 {strides = array<i32>} : memref<1x16xf32, #tpu.memory_space<vmem>>, vector<1x16xf32>,
    return
  }
  func.func @transform_0(%arg0: i32) -> (i32, i32) {
    %c0_i32 = arith.constant 0 : i32
    %c0_i32_0 = arith.constant 0 : i32
    return %arg0, %c0_i32 : i32, i32
  }
  func.func @transform_1(%arg0: i32) -> (i32, i32) {
    %c0_i32 = arith.constant 0 : i32
    %c0_i32_0 = arith.constant 0 : i32
    %c0_i32_1 = arith.constant 0 : i32
    return %c0_i32, %c0_i32_0 : i32, i32
  }
  func.func @transform_2(%arg0: i32) -> i32 {
    %c0_i32 = arith.constant 0 : i32
    %c0_i32_0 = arith.constant 0 : i32
    return %c0_i32 : i32
  }
  func.func @transform_3(%arg0: i32) -> (i32, i32) {
    %c0_i32 = arith.constant 0 : i32
    %c0_i32_0 = arith.constant 0 : i32
    return %c0_i32, %arg0 : i32, i32
  }
}

</mosaic_0001>

<bundles_post_ra>
// kernel: tpu_custom_call.1
= control target key start
LH: loop header
LB: loop body
LE: loop exit
PB: predicated region body
PF: predicated region fallthrough
CT: control target
= control target key end

     0   :  { %9 = vsyncpa [#allocation4], 0  ;;  %s261_s0 = inlined_call_operand.hbm [shape: f32[16,32], index: 0, kind: input, shape index: {}]   ;;  %s262_s1 = inlined_call_operand.vmem [shape: f32[1,32], index: 1, kind: input, shape index: {}]   ;;  %s263_s2 = inlined_call_operand.<no memory space> [shape: f32[1], index: 2, kind: input, shape index: {}]   ;;  %s264_s3 = inlined_call_operand.hbm [shape: f32[1,16], index: 3, kind: output, shape index: {}]  }
   0x1   :  { %10 = vsyncpa [#allocation5], 0  ;;  %s204_s12 = smov [#allocation3]   ;;  %s156_s16 = scalar_lea.hbm %s261_s0, 256 }
   0x2   :  { %s16_s13 = sshll.u32 %s204_s12, 4  ;;  %p157_p0 = scmp.ne.s32.totalorder %s261_s0, %s156_s16  ;;  %s17_s13 = int_to_ptr.vmem [resolvable:$true] %s16_s13 }
   0x3   :  { %p160_p1 = scmp.lt.u32.totalorder %s156_s16, %s261_s0 }
   0x5   :  { %p162_p2 = pnand %p160_p1, %p157_p0 }
   0x7   :  { %165 = shalt.err (!%p162_p2)
}
   0x8   :  { %s166_s21 = scalar_lea.vmem %s17_s13, 256  ;;  %p171_p4 = scmp.lt.s32.totalorder %s17_s13, %s17_s13 }
   0x9   :  { %p167_p3 = scmp.ne.s32.totalorder %s17_s13, %s166_s21  ;;  %p172_p5 = scmp.lt.s32.totalorder %s166_s21, %s166_s21 }
   0xb   :  { %p173_p6 = por %p172_p5, %p171_p4 }
   0xd   :  { %p174_p7 = pnand %p173_p6, %p167_p3 }
   0xf   :  { %177 = shalt.err (!%p174_p7)
}
  0x10   :  { %s205_s22 = smov 128   ;;  %s206_s23 = smov 8  }
  0x11   :  { %22 = dma.hbm_to_vmem [thread:$0]  %s261_s0, 256, %s17_s13, [#allocation4], %s205_s22, %s205_s22, %s206_s23  }
  0x12   :  { %200 = dma.done.wait [#allocation4], 256  }
  0x13   :  { %201 = vsyncadd [#allocation4], 4294967040  ;;  %v207_v0 = vmov 0.0|0.0   ;;  %vm208_vm0 = vmmov 0   ;;  %v209_v1 = vmov 0.0   ;;  %vm35_vm1 = vcmask 261120  }
  0x14   :  { %145 = vmatprep.subr.bf16.mxu0 %v207_v0  ;;  %142 = vmatprep.mubr.msk.f32.mxu0 %vm208_vm0, %v209_v1  ;;  %v31_v2 = vld [vmem:[#allocation3] sm:$0xff]  ;;  %v32_v3 = vld [vmem:[#allocation3 + $0x8] sm:$0xff]  ;;  %vm147_vm2 = vmpackc.low %vm35_vm1, %vm35_vm1  ;;  %v34_v6 = vstv %s263_s2  ;;  %s210_s29 = smov [#allocation6]   ;;  %vm115_vm3 = vcmask 122880  }
  0x15   :  { %v146_v4 = vpack.c.bf16 %v32_v3, %v31_v2  ;;  %v30_v5 = vld [vmem:[%s262_s1] sm:$0x1]  ;;  %s123_s30 = sshll.u32 %s210_s29, 4  ;;  %s124_s30 = int_to_ptr.vmem [resolvable:$true] %s123_s30 }
  0x16   :  { %s178_s4 = scalar_lea.vmem %s124_s30, 16  ;;  %s182_s5 = scalar_lea.vmem %s124_s30, 32 }
  0x17   :  { %148 = vmatpush3.bf16.xpose.msk.msra.mxu0 %vm147_vm2, %v146_v4  ;;  %p179_p8 = scmp.ne.s32.totalorder %s124_s30, %s178_s4  ;;  %p183_p9 = scmp.lt.s32.totalorder %s124_s30, %s124_s30 }
  0x18   :  { %p184_p10 = scmp.lt.s32.totalorder %s182_s5, %s178_s4 }
  0x1a   :  { %p185_p11 = por %p184_p10, %p183_p9 }
  0x1c   :  { %p186_p12 = pnand %p185_p11, %p179_p8 }
  0x1e   :  { %143 = vmatmul.mubr.msk.f32.vlgmr.msra.gmra.mrb[0].mxu0 %vm35_vm1, %v30_v5 }
  0xf1   :  { %v111_v7 = vpop.f32.mrb[0].mxu0 }
  0xf2   :  { %v112_v8 = vadd.f32 %v111_v7, %v34_v6  ;;  %v144_v9 = vpop.f32.mrb[1].mxu0 }
  0xf4   :  { %116 = vst.msk [vmem:[#allocation6] sm:$0x1] %vm115_vm3, %v112_v8 }
  0xf5   :  { %189 = shalt.err (!%p186_p12)
}
  0xf6   :  { %s190_s2 = scalar_lea.hbm %s264_s3, 16 }
  0xf7   :  { %p191_p13 = scmp.ne.s32.totalorder %s264_s3, %s190_s2  ;;  %p194_p0 = scmp.lt.u32.totalorder %s190_s2, %s264_s3 }
  0xf9   :  { %p196_p1 = pnand %p194_p0, %p191_p13 }
  0xfb   :  { %199 = shalt.err (!%p196_p1)
}
  0xfc   :  { %126 = dma.vmem_to_hbm [thread:$0]  %s124_s30, 16, %s264_s3, [#allocation5]  }
  0xfd   :  { %202 = dma.done.wait [#allocation5], 16  }
  0xfe   :  { %203 = vsyncadd [#allocation5], 4294967280 }
  0xff   :  { %130 = vsyncpa [#allocation4], 1 }
 0x100   :  { %131 = vsyncpa [#allocation5], 1 }

</bundles_post_ra>
